<compile_context>
chip_gen: v6e
topology: v6e:2x2x1
jax: 0.10.0
libtpu: 0.0.40
codegen_flags: <defaults>
</compile_context>

<pallas_src>
import jax
import jax.numpy as jnp
from jax import lax
from jax.experimental import pallas as pl
from jax.experimental.pallas import tpu as pltpu


def _round_up(n, m):
    return ((n + m - 1) // m) * m


# ----------------------------------------------------------------------------
# Kernel 1: inference path  ->  softmax(x @ W^T + b, dim=1)
#   x_ref: [TB, D], wt_ref: [D, CP], b_ref: [1, CP], o_ref: [TB, C]
# Padded class columns have zero weights and bias -1e30, so exp() underflows to
# exactly 0 and they never affect the softmax denominator; only the first C
# lanes are stored (small masked store, large writeback saving).
# ----------------------------------------------------------------------------
def softmax_kernel(x_ref, wt_ref, b_ref, o_ref):
    logits = jnp.dot(x_ref[...], wt_ref[...],
                     preferred_element_type=jnp.float32) + b_ref[...]
    m = jnp.max(logits, axis=1, keepdims=True)
    e = jnp.exp(logits - m)                 # padded classes -> exactly 0
    s = jnp.sum(e, axis=1, keepdims=True)
    probs = e / s                           # exact division (1e-5 tolerance)
    o_ref[...] = probs[:, :o_ref.shape[1]].astype(o_ref.dtype)


# ----------------------------------------------------------------------------
# Kernel 2: training path  ->  per-row cross-entropy(x @ W^T + b, y)
# Same matmul / max / exp / sum pipeline, emits one loss per row.  No grid-step
# accumulator and no program_id dependence, so the batch axis is fully
# "parallel" (v7x dual-TC friendly).  Rows of the ragged last tile beyond B are
# simply never written back by Pallas, so no masking is needed.
# ----------------------------------------------------------------------------
def ce_rowloss_kernel(x_ref, wt_ref, b_ref, y_ref, o_ref):
    logits = jnp.dot(x_ref[...], wt_ref[...],
                     preferred_element_type=jnp.float32) + b_ref[...]
    m = jnp.max(logits, axis=1, keepdims=True)
    lse = jnp.log(jnp.sum(jnp.exp(logits - m), axis=1, keepdims=True)) + m
    # Gather the target-class logit via a one-hot built from a 2-D iota.
    classes = lax.broadcasted_iota(jnp.int32, logits.shape, 1)
    onehot = (classes == y_ref[...]).astype(jnp.float32)
    picked = jnp.sum(onehot * logits, axis=1, keepdims=True)
    o_ref[...] = (lse - picked).astype(o_ref.dtype)


# ----------------------------------------------------------------------------
# One-time parameter repacking (hoisted out of the per-forward path).
#   w: [C, D] (PyTorch nn.Linear layout), b: [C]
# Returns wt_padded [D, CP] (CP = classes rounded up to 128) and b_padded
# [1, CP] whose padded columns hold -1e30 so they vanish from softmax / LSE.
# ----------------------------------------------------------------------------
def prepare_params(w, b):
    C, D = w.shape
    CP = _round_up(max(C, 1), 128)
    wt_padded = jnp.zeros((D, CP), jnp.float32).at[:, :C].set(
        w.astype(jnp.float32).T)
    b_padded = jnp.full((1, CP), -1e30, jnp.float32).at[0, :C].set(
        b.astype(jnp.float32))
    return wt_padded, b_padded, C


# ----------------------------------------------------------------------------
# Forward, mimicking TorchModel.forward(x, y=None).
#   x: [B, D] f32, (wt_padded, b_padded, num_classes) from prepare_params,
#   y: [B, 1] (or [B]) integer class ids.
# ----------------------------------------------------------------------------
def torch_model_forward(x, wt_padded, b_padded, num_classes, y=None, *,
                        tb_max=1024):
    B, D = x.shape
    CP = wt_padded.shape[1]

    x = x.astype(jnp.float32)
    TB = min(_round_up(max(B, 1), 8), tb_max)   # sublane-aligned batch tile
    grid = (pl.cdiv(B, TB),)                    # ragged last tile handled by Pallas

    x_spec = pl.BlockSpec((TB, D), lambda i: (i, 0))
    wt_spec = pl.BlockSpec((D, CP), lambda i: (0, 0))    # resident weight tile
    b_spec = pl.BlockSpec((1, CP), lambda i: (0, 0))     # resident bias tile
    params = pltpu.CompilerParams(dimension_semantics=("parallel",))

    if y is None:
        return pl.pallas_call(
            softmax_kernel,
            out_shape=jax.ShapeDtypeStruct((B, num_classes), jnp.float32),
            grid=grid,
            in_specs=[x_spec, wt_spec, b_spec],
            out_specs=pl.BlockSpec((TB, num_classes), lambda i: (i, 0)),
            compiler_params=params,
        )(x, wt_padded, b_padded)

    # Equivalent of y.squeeze().long(); trivially cheap reshape/cast, no padding.
    yp = y.reshape(-1, 1).astype(jnp.int32)
    per_row = pl.pallas_call(
        ce_rowloss_kernel,
        out_shape=jax.ShapeDtypeStruct((B, 1), jnp.float32),
        grid=grid,
        in_specs=[x_spec, wt_spec, b_spec,
                  pl.BlockSpec((TB, 1), lambda i: (i, 0))],
        out_specs=pl.BlockSpec((TB, 1), lambda i: (i, 0)),
        compiler_params=params,
    )(x, wt_padded, b_padded, yp)
    # Tiny final reduction (mean over B) in the wrapper, as suggested by review.
    return jnp.sum(per_row) / B


if __name__ == "__main__":
    # Shapes consistent with TorchModel(input_size): B=8, input_size=32, 5 classes.
    B, D, C = 8, 32, 5

    key = jax.random.PRNGKey(0)
    kx, kw, kb, ky = jax.random.split(key, 4)

    x = jax.random.normal(kx, (B, D), dtype=jnp.float32)
    w = jax.random.normal(kw, (C, D), dtype=jnp.float32) * 0.1
    b = jax.random.normal(kb, (C,), dtype=jnp.float32) * 0.1
    y = jax.random.randint(ky, (B, 1), 0, C, dtype=jnp.int32)

    # Hoisted parameter repacking: once per parameter update, not per forward.
    wt_p, b_p, nc = prepare_params(w, b)

    # Inference path: softmax probabilities.  Training path: mean CE loss.
    probs = jax.block_until_ready(torch_model_forward(x, wt_p, b_p, nc))
    loss = jax.block_until_ready(torch_model_forward(x, wt_p, b_p, nc, y))

    # Pure-JAX reference.
    logits_ref = x @ w.T + b
    probs_ref = jax.nn.softmax(logits_ref, axis=1)
    loss_ref = jnp.mean(jax.nn.logsumexp(logits_ref, axis=1)
                        - logits_ref[jnp.arange(B), y.reshape(-1)])
    assert probs.shape == (B, C)
    assert jnp.allclose(probs, probs_ref, atol=1e-5), "softmax mismatch"
    assert jnp.allclose(loss, loss_ref, atol=1e-5), "cross-entropy mismatch"

    # Extra check: multi-tile grid with a ragged last tile (exercises cdiv grid
    # + masked OOB writes introduced by dropping the batch padding).
    B2 = 300
    k2x, k2y = jax.random.split(jax.random.PRNGKey(1))
    x2 = jax.random.normal(k2x, (B2, D), dtype=jnp.float32)
    y2 = jax.random.randint(k2y, (B2, 1), 0, C, dtype=jnp.int32)
    probs2 = jax.block_until_ready(
        torch_model_forward(x2, wt_p, b_p, nc, tb_max=64))
    loss2 = jax.block_until_ready(
        torch_model_forward(x2, wt_p, b_p, nc, y2, tb_max=64))
    logits2_ref = x2 @ w.T + b
    probs2_ref = jax.nn.softmax(logits2_ref, axis=1)
    loss2_ref = jnp.mean(jax.nn.logsumexp(logits2_ref, axis=1)
                         - logits2_ref[jnp.arange(B2), y2.reshape(-1)])
    assert jnp.allclose(probs2, probs2_ref, atol=1e-5), "ragged softmax mismatch"
    assert jnp.allclose(loss2, loss2_ref, atol=1e-5), "ragged cross-entropy mismatch"

    print("KERNEL_OK")
</pallas_src>

<mosaic_0001>
module attributes {stable_mosaic.version = 11 : i64} {
  func.func @softmax_kernel(%arg0: i32, %arg1: memref<8x32xf32, #tpu.memory_space<vmem>>, %arg2: memref<32x128xf32, #tpu.memory_space<vmem>>, %arg3: memref<1x128xf32, #tpu.memory_space<vmem>>, %arg4: memref<8x5xf32, #tpu.memory_space<vmem>>) attributes {dimension_semantics = [#tpu.dimension_semantics<parallel>], iteration_bounds = array<i64: 1>, scalar_prefetch = 0 : i64, scratch_operands = 0 : i64, tpu.core_type = #tpu.core_type<tc>, window_params = [{transform_indices = @transform_0, window_bounds = array<i64: 8, 32>}, {pipeline_mode = #tpu.pipeline_mode<synchronous>, transform_indices = @transform_1, window_bounds = array<i64: 32, 128>}, {pipeline_mode = #tpu.pipeline_mode<synchronous>, transform_indices = @transform_2, window_bounds = array<i64: 1, 128>}, {transform_indices = @transform_3, window_bounds = array<i64: 8, 5>}]} {
    %c0 = arith.constant 0 : index
    %c0_0 = arith.constant 0 : index
    %0 = vector.load %arg1[%c0, %c0_0] : memref<8x32xf32, #tpu.memory_space<vmem>>, vector<8x32xf32>
    %c0_1 = arith.constant 0 : index
    %c0_2 = arith.constant 0 : index
    %1 = vector.load %arg2[%c0_1, %c0_2] : memref<32x128xf32, #tpu.memory_space<vmem>>, vector<32x128xf32>
    %cst = arith.constant dense<0.000000e+00> : vector<8x128xf32>
    %2 = tpu.matmul %0, %1, %cst {dimension_numbers = #tpu.dot_dimension_numbers<[1], [0], [0], [1], [0, 0, 1, 1], [], []>} : vector<8x32xf32>, vector<32x128xf32>, vector<8x128xf32> -> vector<8x128xf32>
    %c0_3 = arith.constant 0 : index
    %c0_4 = arith.constant 0 : index
    %3 = vector.load %arg3[%c0_3, %c0_4] : memref<1x128xf32, #tpu.memory_space<vmem>>, vector<1x128xf32>
    %4 = vector.broadcast %3 : vector<1x128xf32> to vector<8x128xf32>
    %5 = arith.addf %2, %4 : vector<8x128xf32>
    %cst_5 = arith.constant dense<0xFF800000> : vector<8xf32>
    %6 = vector.multi_reduction <maximumf>, %5, %cst_5 [1] : vector<8x128xf32> to vector<8xf32>
    %7 = vector.shape_cast %6 : vector<8xf32> to vector<8x1xf32>
    %8 = vector.broadcast %7 : vector<8x1xf32> to vector<8x128xf32>
    %9 = arith.subf %5, %8 : vector<8x128xf32>
    %10 = math.exp %9 : vector<8x128xf32>
    %cst_6 = arith.constant dense<0.000000e+00> : vector<8xf32>
    %11 = vector.multi_reduction <add>, %10, %cst_6 [1] : vector<8x128xf32> to vector<8xf32>
    %12 = vector.shape_cast %11 : vector<8xf32> to vector<8x1xf32>
    %13 = vector.broadcast %12 : vector<8x1xf32> to vector<8x128xf32>
    %14 = arith.divf %10, %13 : vector<8x128xf32>
    %15 = vector.extract_strided_slice %14 {offsets = [0, 0], sizes = [8, 5], strides = [1, 1]} : vector<8x128xf32> to vector<8x5xf32>
    %c0_7 = arith.constant 0 : index
    %c0_8 = arith.constant 0 : index
    %16 = vector.load %arg4[%c0_7, %c0_8] : memref<8x5xf32, #tpu.memory_space<vmem>>, vector<8x5xf32>
    tpu.vector_store %arg4[%c0_7, %c0_8], %15 {strides = array<i32>} : memref<8x5xf32, #tpu.memory_space<vmem>>, vector<8x5xf32>,
    return
  }
  func.func @transform_0(%arg0: i32) -> (i32, i32) {
    %c0_i32 = arith.constant 0 : i32
    %c0_i32_0 = arith.constant 0 : i32
    return %arg0, %c0_i32 : i32, i32
  }
  func.func @transform_1(%arg0: i32) -> (i32, i32) {
    %c0_i32 = arith.constant 0 : i32
    %c0_i32_0 = arith.constant 0 : i32
    %c0_i32_1 = arith.constant 0 : i32
    return %c0_i32, %c0_i32_0 : i32, i32
  }
  func.func @transform_2(%arg0: i32) -> (i32, i32) {
    %c0_i32 = arith.constant 0 : i32
    %c0_i32_0 = arith.constant 0 : i32
    %c0_i32_1 = arith.constant 0 : i32
    return %c0_i32, %c0_i32_0 : i32, i32
  }
  func.func @transform_3(%arg0: i32) -> (i32, i32) {
    %c0_i32 = arith.constant 0 : i32
    %c0_i32_0 = arith.constant 0 : i32
    return %arg0, %c0_i32 : i32, i32
  }
}

</mosaic_0001>

<bundles_post_ra>
// kernel: tpu_custom_call.1
= control target key start
LH: loop header
LB: loop body
LE: loop exit
PB: predicated region body
PF: predicated region fallthrough
CT: control target
= control target key end

     0   :  { %8 = vsyncpa [#allocation3], 0  ;;  %s288_s0 = inlined_call_operand.hbm [shape: f32[8,32], index: 0, kind: input, shape index: {}]   ;;  %s289_s1 = inlined_call_operand.hbm [shape: f32[32,128], index: 1, kind: input, shape index: {}]   ;;  %s290_s2 = inlined_call_operand.vmem [shape: f32[1,128], index: 2, kind: input, shape index: {}]   ;;  %s291_s3 = inlined_call_operand.hbm [shape: f32[8,5], index: 3, kind: output, shape index: {}]  }
   0x1   :  { %9 = vsyncpa [#allocation6], 0 }
   0x2   :  { %10 = vsyncpa [#allocation4], 0  ;;  %s249_s12 = smov [#allocation2]   ;;  %s250_s14 = smov [#allocation5]  }
   0x3   :  { %s17_s13 = sshll.u32 %s249_s12, 4  ;;  %s26_s15 = sshll.u32 %s250_s14, 4  ;;  %s18_s13 = int_to_ptr.vmem [resolvable:$true] %s17_s13  ;;  %s27_s15 = int_to_ptr.vmem [resolvable:$true] %s26_s15 }
   0x4   :  { %s191_s16 = scalar_lea.vmem %s18_s13, 128  ;;  %p196_p1 = scmp.lt.s32.totalorder %s18_s13, %s18_s13 }
   0x5   :  { %p192_p0 = scmp.ne.s32.totalorder %s18_s13, %s191_s16  ;;  %p197_p2 = scmp.lt.s32.totalorder %s191_s16, %s191_s16 }
   0x7   :  { %p198_p3 = por %p197_p2, %p196_p1 }
   0x9   :  { %p199_p4 = pnand %p198_p3, %p192_p0 }
   0xb   :  { %202 = shalt.err (!%p199_p4)
}
   0xc   :  { %20 = dma.hbm_to_vmem [thread:$0]  %s288_s0, 128, %s18_s13, [#allocation3]  }
   0xd   :  { %s211_s19 = scalar_lea.vmem %s27_s15, 512  ;;  %p216_p6 = scmp.lt.s32.totalorder %s27_s15, %s27_s15 }
   0xe   :  { %p212_p5 = scmp.ne.s32.totalorder %s27_s15, %s211_s19  ;;  %p217_p7 = scmp.lt.s32.totalorder %s211_s19, %s211_s19 }
  0x10   :  { %p218_p8 = por %p217_p7, %p216_p6 }
  0x12   :  { %p219_p9 = pnand %p218_p8, %p212_p5 }
  0x14   :  { %222 = shalt.err (!%p219_p9)
}
  0x15   :  { %s251_s20 = smov 128   ;;  %s252_s21 = smov 8  }
  0x16   :  { %32 = dma.hbm_to_vmem [thread:$0]  %s289_s1, 512, %s27_s15, [#allocation6], %s251_s20, %s251_s20, %s252_s21  }
  0x17   :  { %243 = dma.done.wait [#allocation3], 128  }
  0x18   :  { %244 = vsyncadd [#allocation3], 4294967168 }
  0x19   :  { %245 = dma.done.wait [#allocation6], 512  }
  0x1a   :  { %246 = vsyncadd [#allocation6], 4294966784  ;;  %v253_v0 = vmov 0.0   ;;  %vm254_vm0 = vmmov 0   ;;  %v45_v1 = vld [vmem:[#allocation5 + $0x18] sm:$0xff]  ;;  %v44_v2 = vld [vmem:[#allocation5 + $0x10] sm:$0xff] }
  0x1b   :  { %161 = vmatprep.subr.mxu0 %v253_v0  ;;  %169 = vmatprep.mubr.msk.f32.mxu0 %vm254_vm0, %v253_v0  ;;  %v43_v3 = vld [vmem:[#allocation5 + $0x8] sm:$0xff]  ;;  %v42_v4 = vld [vmem:[#allocation5] sm:$0xff]  ;;  %v41_v5 = vld [vmem:[#allocation2] sm:$0xff]  ;;  %vm53_vm1 = vcmask 261120   ;;  %s255_s24 = smov [#allocation7]   ;;  %vm136_vm2 = vcmask 39936  }
  0x1c   :  { %162 = vmatpush3.msra.mxu0 %v45_v1  ;;  %v154_v6 = vld [vmem:[%s290_s2] ss:$0 sm:$0xff]  ;;  %s144_s25 = sshll.u32 %s255_s24, 4  ;;  %s145_s25 = int_to_ptr.vmem [resolvable:$true] %s144_s25 }
  0x1d   :  { %163 = vmatprep.subr.mxu0 %v253_v0  ;;  %s223_s2 = scalar_lea.vmem %s145_s25, 128  ;;  %p228_p11 = scmp.lt.s32.totalorder %s145_s25, %s145_s25 }
  0x1e   :  { %164 = vmatpush3.msra.mxu0 %v44_v2  ;;  %p224_p10 = scmp.ne.s32.totalorder %s145_s25, %s223_s2  ;;  %p229_p12 = scmp.lt.s32.totalorder %s223_s2, %s223_s2 }
  0x1f   :  { %165 = vmatprep.subr.mxu0 %v253_v0 }
  0x20   :  { %166 = vmatpush3.msra.mxu0 %v43_v3  ;;  %p230_p13 = por %p229_p12, %p228_p11 }
  0x21   :  { %167 = vmatprep.subr.mxu0 %v253_v0 }
  0x22   :  { %168 = vmatpush3.msra.mxu0 %v42_v4  ;;  %p231_p0 = pnand %p230_p13, %p224_p10 }
  0x23   :  { %170 = vmatmul.mubr.msk.f32.vlgmr.msra.gmra.mxu0 %vm53_vm1, %v41_v5 }
  0xe3   :  { %v123_v7 = vpop.f32.mrf.mxu0 }
  0xe4   :  { %v124_v8 = vadd.f32 %v154_v6, %v123_v7 }
  0xe5   :  { %v171_v9 = vpop.f32.mrf.mxu0 }
  0xe6   :  { %127 = vmax.xlane.f32.xlu0 %v124_v8 }
 0x16f   :  { %v128_v10 = vpop.xlane.xlu0 %127 }
 0x170   :  { %v129_v11 = vsub.f32 %v124_v8, %v128_v10 }
 0x172   :  { %v130_v12 = vmul.f32 1.442695, %v129_v11 }
 0x174   :  { %179 = vpow2.f32 %v130_v12 }
 0x181   :  { %v180_v13 = vpop.eup %179 }
 0x182   :  { %132 = vadd.xlane.f32.xlu0 %v180_v13 }
 0x20b   :  { %v133_v14 = vpop.xlane.xlu0 %132 }
 0x20c   :  { %181 = vrcp.f32 %v133_v14 }
 0x219   :  { %v182_v15 = vpop.eup %181 }
 0x21a   :  { %v135_v16 = vmul.f32 %v182_v15, %v180_v13 }
 0x21c   :  { %137 = vst.msk [vmem:[#allocation7] sm:$0xff] %vm136_vm2, %v135_v16 }
 0x21d   :  { %234 = shalt.err (!%p231_p0)
}
 0x21e   :  { %147 = dma.vmem_to_hbm [thread:$0]  %s145_s25, 128, %s291_s3, [#allocation4]  }
 0x21f   :  { %247 = dma.done.wait [#allocation4], 128  }
 0x220   :  { %248 = vsyncadd [#allocation4], 4294967168 }
 0x221   :  { %151 = vsyncpa [#allocation3], 1 }
 0x222   :  { %152 = vsyncpa [#allocation6], 1 }
 0x223   :  { %153 = vsyncpa [#allocation4], 1 }

</bundles_post_ra>
